<compile_context>
chip_gen: v5e
topology: v5e:2x2
jax: 0.10.0
libtpu: 0.0.40
codegen_flags: <defaults>
</compile_context>

<pallas_src>
import functools

import numpy as np
import jax
import jax.numpy as jnp
from jax.experimental import pallas as pl
from jax.experimental.pallas import tpu as pltpu


# ----------------------------------------------------------------------------
# helpers
# ----------------------------------------------------------------------------
def _rup(x, m):
    return ((x + m - 1) // m) * m


def _pick_tile(dim, cands):
    for c in cands:
        if dim % c == 0:
            return c
    return cands[-1]


# ----------------------------------------------------------------------------
# Pallas kernels
# ----------------------------------------------------------------------------
def _mm_kernel(*refs, out_relu, in_relu, has_sc):
    if has_sc:
        a_ref, b_ref, bias_ref, sc_ref, o_ref, acc_ref = refs
    else:
        a_ref, b_ref, bias_ref, o_ref, acc_ref = refs
        sc_ref = None

    k = pl.program_id(2)

    @pl.when(k == 0)
    def _():
        acc_ref[...] = jnp.zeros_like(acc_ref)

    a = a_ref[...]
    if in_relu:                       # ReLU of the conv input, fused (free VALU)
        a = jnp.maximum(a, 0)
    acc_ref[...] += jnp.dot(a, b_ref[...], preferred_element_type=jnp.float32)

    @pl.when(k == pl.num_programs(2) - 1)
    def _():
        out = acc_ref[...] + bias_ref[...]
        if sc_ref is not None:        # fused residual add
            out = out + sc_ref[...].astype(jnp.float32)
        if out_relu:
            out = jnp.maximum(out, 0.0)
        o_ref[...] = out.astype(o_ref.dtype)


def pallas_matmul(a, b, bias=None, *, out_relu=False, in_relu=False, sc=None,
                  out_dtype=jnp.bfloat16, precise=False):
    """(M,K) @ (K,N) + bias [+ sc] with optional fused input/output ReLU.

    bf16 operands / f32 accumulation; M, N, K fully tiled; K innermost
    ("arbitrary"), M/N "parallel" for megacore sharding on v7x.
    """
    M, K = a.shape
    Kb, N = b.shape
    assert K == Kb
    in_dt = jnp.float32 if precise else jnp.bfloat16
    a = a.astype(in_dt)
    b = b.astype(in_dt)
    bias = (jnp.zeros((N,), jnp.float32) if bias is None
            else bias.astype(jnp.float32))

    Np = _rup(N, 128)                         # lane-dense output columns
    Kp = _rup(K, 128)
    TM = min(512, _rup(M, 8))
    Mp = _rup(M, TM)
    TN = _pick_tile(Np, (256, 128))
    TK = _pick_tile(Kp, (512, 384, 256, 128))

    if (Mp, Kp) != (M, K):
        a = jnp.pad(a, ((0, Mp - M), (0, Kp - K)))
    if (Kp, Np) != (K, N):
        b = jnp.pad(b, ((0, Kp - K), (0, Np - N)))
    bias2 = jnp.pad(bias, (0, Np - N)).reshape(1, Np)

    in_specs = [
        pl.BlockSpec((TM, TK), lambda j, i, k: (i, k)),
        pl.BlockSpec((TK, TN), lambda j, i, k: (k, j)),
        pl.BlockSpec((1, TN), lambda j, i, k: (0, j)),
    ]
    args = [a, b, bias2]
    has_sc = sc is not None
    if has_sc:
        scp = sc.astype(in_dt)
        if scp.shape != (Mp, Np):
            scp = jnp.pad(scp, ((0, Mp - scp.shape[0]), (0, Np - scp.shape[1])))
        in_specs.append(pl.BlockSpec((TM, TN), lambda j, i, k: (i, j)))
        args.append(scp)

    out = pl.pallas_call(
        functools.partial(_mm_kernel, out_relu=out_relu, in_relu=in_relu,
                          has_sc=has_sc),
        out_shape=jax.ShapeDtypeStruct((Mp, Np), out_dtype),
        grid=(Np // TN, Mp // TM, Kp // TK),
        in_specs=in_specs,
        out_specs=pl.BlockSpec((TM, TN), lambda j, i, k: (i, j)),
        scratch_shapes=[pltpu.VMEM((TM, TN), jnp.float32)],
        compiler_params=pltpu.CompilerParams(
            dimension_semantics=("parallel", "parallel", "arbitrary"),
            vmem_limit_bytes=48 * 1024 * 1024),
    )(*args)
    if (Mp, Np) != (M, N):
        out = out[:M, :N]
    return out


def _sum_relu_kernel(x_ref, o_ref):
    x = jnp.maximum(x_ref[...].astype(jnp.float32), 0.0)
    o_ref[...] = jnp.sum(x, axis=1, keepdims=True)


def pallas_sum_spatial_relu(x):
    """x: (N, H, W, C) -> (N, C) = sum_{h,w} relu(x)."""
    N, H, W, C = x.shape
    x2 = x.reshape(N, H * W, C)
    out = pl.pallas_call(
        _sum_relu_kernel,
        out_shape=jax.ShapeDtypeStruct((N, 1, C), jnp.float32),
        grid=(N,),
        in_specs=[pl.BlockSpec((1, H * W, C), lambda i: (i, 0, 0))],
        out_specs=pl.BlockSpec((1, 1, C), lambda i: (i, 0, 0)),
        compiler_params=pltpu.CompilerParams(
            dimension_semantics=("parallel",)),
    )(x2)
    return out[:, 0, :]


# ----------------------------------------------------------------------------
# Parameter setup (plain JAX glue) — spectral norm with one power iteration,
# matching nn.utils.spectral_norm's training-mode forward. Conv weights are
# folded into im2col matrices with channel dims zero-padded to multiples of
# 128 so every Pallas store is lane-dense.
# ----------------------------------------------------------------------------
def _l2normalize(v, eps):
    return v / jnp.maximum(jnp.linalg.norm(v), eps)


def spectral_normalize(w, u, eps, n_iter=1):
    w_mat = w.reshape(w.shape[0], -1)
    v = None
    for _ in range(n_iter):
        v = _l2normalize(w_mat.T @ u, eps)
        u = _l2normalize(w_mat @ v, eps)
    sigma = jnp.dot(u, w_mat @ v)
    return w / sigma


def init_conv(key, cin, cout, k, pad_cin=True):
    kw, kb, ku = jax.random.split(key, 3)
    w = jax.random.normal(kw, (cout, cin, k, k), jnp.float32) * 0.05
    b = jax.random.normal(kb, (cout,), jnp.float32) * 0.05
    u = _l2normalize(jax.random.normal(ku, (cout,), jnp.float32), 1e-12)
    w_sn = spectral_normalize(w, u, eps=1e-4)          # conv2d() uses eps=0.0001
    cinp = _rup(cin, 128) if pad_cin else cin
    coutp = _rup(cout, 128)
    w_t = jnp.transpose(w_sn, (2, 3, 1, 0))            # (k, k, cin, cout)
    w_t = jnp.pad(w_t, ((0, 0), (0, 0), (0, cinp - cin), (0, coutp - cout)))
    w_mat = w_t.reshape(k * k * cinp, coutp).astype(jnp.bfloat16)
    b_p = jnp.pad(b, (0, coutp - cout))
    return {"w_mat": w_mat, "b": b_p, "k": k, "pad": (k - 1) // 2, "cout": cout}


def init_linear(key, cin, cout):
    kw, kb, ku = jax.random.split(key, 3)
    w = jax.random.normal(kw, (cout, cin), jnp.float32) * 0.05
    b = jax.random.normal(kb, (cout,), jnp.float32) * 0.05
    u = _l2normalize(jax.random.normal(ku, (cout,), jnp.float32), 1e-12)
    return {"w": spectral_normalize(w, u, eps=1e-12), "b": b}


def init_embedding(key, num, dim):
    kw, ku = jax.random.split(key)
    w = jax.random.normal(kw, (num, dim), jnp.float32)
    u = _l2normalize(jax.random.normal(ku, (num,), jnp.float32), 1e-12)
    return {"w": spectral_normalize(w, u, eps=1e-12)}


def init_opt_block(key, cin, cout):
    k1, k2, k3 = jax.random.split(key, 3)
    return {
        "conv1": init_conv(k1, cin, cout, 3, pad_cin=False),
        "conv2": init_conv(k2, cout, cout, 3),
        "c_sc": init_conv(k3, cin, cout, 1, pad_cin=False),
        "down": True,
    }


def init_res_block(key, cin, cout, downsample):
    k1, k2, k3 = jax.random.split(key, 3)
    learnable = (cin != cout) or downsample
    p = {
        "conv1": init_conv(k1, cin, cout, 3),
        "conv2": init_conv(k2, cout, cout, 3),
        "down": downsample,
        "learnable": learnable,
    }
    if learnable:
        p["c_sc"] = init_conv(k3, cin, cout, 1)
    return p


def init_params(key, ch, num_classes):
    ks = jax.random.split(key, 12)
    return {
        "ch": ch,
        "block1": init_opt_block(ks[0], 3, ch),
        "block2": init_res_block(ks[1], ch, ch * 2, True),
        "block3": init_res_block(ks[2], ch * 2, ch * 4, True),
        "block4": init_res_block(ks[3], ch * 4, ch * 8, True),
        "block5": init_res_block(ks[4], ch * 8, ch * 16, True),
        "block6": init_res_block(ks[5], ch * 16, ch * 16, False),
        "l7": init_linear(ks[6], ch * 16, 1),
        "block_obj3": init_res_block(ks[7], ch * 2, ch * 4, False),
        "block_obj4": init_res_block(ks[8], ch * 4, ch * 8, False),
        "block_obj5": init_res_block(ks[9], ch * 8, ch * 16, True),
        "l_obj": init_linear(ks[10], ch * 16, 1),
        "l_y": init_embedding(ks[11], num_classes, ch * 16),
    }


# ----------------------------------------------------------------------------
# Layer ops (conv via bf16 im2col + fused Pallas matmul; pooling as glue)
# ----------------------------------------------------------------------------
def conv_apply(p, x, *, out_relu=False, in_relu=False, sc=None):
    N, H, W, C = x.shape
    k, pad = p["k"], p["pad"]
    if k == 1:
        col = x.reshape(N * H * W, C)
    else:
        # TODO(synk): replace materialized im2col by an in-kernel 9-tap
        #             shifted-matmul conv to cut conv-input HBM traffic ~9x.
        xp = jnp.pad(x, ((0, 0), (pad, pad), (pad, pad), (0, 0)))
        patches = [xp[:, ky:ky + H, kx:kx + W, :]
                   for ky in range(k) for kx in range(k)]
        col = jnp.concatenate(patches, axis=-1).reshape(N * H * W, k * k * C)
    sc2 = None if sc is None else sc.reshape(N * H * W, -1)
    out = pallas_matmul(col, p["w_mat"], p["b"], out_relu=out_relu,
                        in_relu=in_relu, sc=sc2)
    return out.reshape(N, H, W, p["w_mat"].shape[1])


def avg_pool2(x):  # 2x2 average pool, stride 2 (glue)
    N, H, W, C = x.shape
    return (x.reshape(N, H // 2, 2, W // 2, 2, C).astype(jnp.float32)
            .mean(axis=(2, 4)).astype(jnp.bfloat16))


def opt_block_fwd(p, x):
    h = conv_apply(p["conv1"], x, out_relu=True)     # ReLU fused into matmul
    h = conv_apply(p["conv2"], h)
    sc_in = x
    if p["down"]:
        h = avg_pool2(h)
        sc_in = avg_pool2(x)
    return conv_apply(p["c_sc"], sc_in, sc=h)        # residual add fused


def res_block_fwd(p, x):
    h = conv_apply(p["conv1"], x, in_relu=True)      # pre-conv ReLU fused
    if p["down"]:
        h = conv_apply(p["conv2"], h, in_relu=True)
        h = avg_pool2(h)
        # 1x1 conv commutes with 2x2 avg-pool, so pool(c_sc(x)) == c_sc(pool(x));
        # the residual add is fused into the (4x smaller) shortcut matmul.
        return conv_apply(p["c_sc"], avg_pool2(x), sc=h)
    sc = conv_apply(p["c_sc"], x) if p["learnable"] else x
    return conv_apply(p["conv2"], h, in_relu=True, sc=sc)


# ----------------------------------------------------------------------------
# RoIAlign (torchvision semantics, sampling_ratio=0, aligned=False)
# TODO(synk): data-dependent bilinear sample grids (per-ROI gh/gw) have no
#             static Pallas grid; kept as host-driven JAX glue.
# ----------------------------------------------------------------------------
def _bilinear_sample(fmap, ys, xs):
    H, W, _ = fmap.shape
    y_ok = (ys >= -1.0) & (ys <= H)
    x_ok = (xs >= -1.0) & (xs <= W)
    y = np.clip(ys, 0.0, None)
    x = np.clip(xs, 0.0, None)
    y_low0 = y.astype(np.int64)
    x_low0 = x.astype(np.int64)
    y_fix = y_low0 >= H - 1
    x_fix = x_low0 >= W - 1
    y_low = np.where(y_fix, H - 1, y_low0)
    y_high = np.where(y_fix, H - 1, y_low0 + 1)
    x_low = np.where(x_fix, W - 1, x_low0)
    x_high = np.where(x_fix, W - 1, x_low0 + 1)
    y = np.where(y_fix, y_low.astype(np.float64), y)
    x = np.where(x_fix, x_low.astype(np.float64), x)
    ly, lx = y - y_low, x - x_low
    hy, hx = 1.0 - ly, 1.0 - lx
    mask = np.outer(y_ok.astype(np.float64), x_ok.astype(np.float64))
    w1 = np.outer(hy, hx) * mask
    w2 = np.outer(hy, lx) * mask
    w3 = np.outer(ly, hx) * mask
    w4 = np.outer(ly, lx) * mask
    yl, yh = jnp.asarray(y_low), jnp.asarray(y_high)
    xl, xh = jnp.asarray(x_low), jnp.asarray(x_high)
    v1 = fmap[yl][:, xl]
    v2 = fmap[yl][:, xh]
    v3 = fmap[yh][:, xl]
    v4 = fmap[yh][:, xh]
    w = lambda a: jnp.asarray(a[..., None], jnp.float32)
    return w(w1) * v1 + w(w2) * v2 + w(w3) * v3 + w(w4) * v4


def roi_align(feat, rois, out_size, spatial_scale):
    N, H, W, C = feat.shape
    oh, ow = out_size
    rois = np.asarray(rois, np.float64)
    if rois.shape[0] == 0:
        return jnp.zeros((0, oh, ow, C), jnp.float32)
    outs = []
    for r in range(rois.shape[0]):
        bidx = int(rois[r, 0])
        x1, y1, x2, y2 = [float(v) * spatial_scale for v in rois[r, 1:5]]
        roi_w = max(x2 - x1, 1.0)
        roi_h = max(y2 - y1, 1.0)
        bin_h, bin_w = roi_h / oh, roi_w / ow
        gh = int(np.ceil(roi_h / oh))
        gw = int(np.ceil(roi_w / ow))
        ys = (y1 + np.arange(oh)[:, None] * bin_h
              + (np.arange(gh)[None, :] + 0.5) * bin_h / gh).reshape(-1)
        xs = (x1 + np.arange(ow)[:, None] * bin_w
              + (np.arange(gw)[None, :] + 0.5) * bin_w / gw).reshape(-1)
        val = _bilinear_sample(feat[bidx], ys, xs)
        val = val.reshape(oh, gh, ow, gw, C).mean(axis=(1, 3))
        outs.append(val)
    return jnp.stack(outs, axis=0)


# ----------------------------------------------------------------------------
# Full forward pass  (matches ResnetDiscriminator128.forward)
# ----------------------------------------------------------------------------
def forward(params, x_nchw, y, bbox):
    ch = params["ch"]
    x = jnp.transpose(x_nchw, (0, 2, 3, 1)).astype(jnp.bfloat16)  # NCHW -> NHWC
    b = int(bbox.shape[0])

    x = opt_block_fwd(params["block1"], x)
    x1 = res_block_fwd(params["block2"], x)
    x2 = res_block_fwd(params["block3"], x1)
    h = res_block_fwd(params["block4"], x2)
    h = res_block_fwd(params["block5"], h)
    h = res_block_fwd(params["block6"], h)
    feat_im = pallas_sum_spatial_relu(h)[:, : ch * 16]      # ReLU+sum fused
    out_im = pallas_matmul(feat_im, params["l7"]["w"].T, params["l7"]["b"],
                           out_dtype=jnp.float32, precise=True)

    # TODO(synk): bbox partition + RoIAlign run on host (forces a mid-graph
    #             sync); a device-side scalar-prefetch gather is future work.
    bbox_np = np.asarray(jax.device_get(bbox))
    y_np = np.asarray(jax.device_get(y))
    s_idx = ((bbox_np[:, 3] - bbox_np[:, 1] < 64)
             & (bbox_np[:, 4] - bbox_np[:, 2] < 64))
    bbox_l, bbox_s = bbox_np[~s_idx], bbox_np[s_idx]
    y_l, y_s = y_np[~s_idx], y_np[s_idx]

    f_s = res_block_fwd(params["block_obj3"], x1)
    f_s = res_block_fwd(params["block_obj4"], f_s)
    f_s = roi_align(f_s, bbox_s, (8, 8), 1.0 / 4.0)
    f_l = res_block_fwd(params["block_obj4"], x2)
    f_l = roi_align(f_l, bbox_l, (8, 8), 1.0 / 8.0)
    obj_feat = jnp.concatenate([f_l, f_s], axis=0).astype(jnp.bfloat16)
    y_cat = jnp.asarray(np.concatenate([y_l, y_s], axis=0), jnp.int32)

    obj_feat = res_block_fwd(params["block_obj5"], obj_feat)
    obj_sum = pallas_sum_spatial_relu(obj_feat)[:, : ch * 16]
    out_obj = pallas_matmul(obj_sum, params["l_obj"]["w"].T,
                            params["l_obj"]["b"],
                            out_dtype=jnp.float32, precise=True)
    emb = jnp.take(params["l_y"]["w"], y_cat, axis=0)
    out_obj = out_obj + jnp.sum(emb.reshape(b, -1) * obj_sum.reshape(b, -1),
                                axis=1, keepdims=True)
    return out_im, out_obj, feat_im, obj_sum


# ----------------------------------------------------------------------------
if __name__ == "__main__":
    ch = 8                 # scaled-down width (original default is 64)
    num_classes = 10
    key = jax.random.PRNGKey(0)
    kp, kx = jax.random.split(key)
    params = init_params(kp, ch, num_classes)

    # 64x64 image keeps feature strides consistent with the 1/4 and 1/8
    # RoIAlign spatial scales used by the module.
    x = jax.random.normal(kx, (2, 3, 64, 64), jnp.float32)
    bbox = jnp.array([[0.0, 4.0, 4.0, 36.0, 40.0],    # small box (batch 0)
                      [0.0, 0.0, 0.0, 64.0, 64.0],    # large box (batch 0)
                      [1.0, 8.0, 8.0, 30.0, 28.0],    # small box (batch 1)
                      [1.0, 0.0, 2.0, 64.0, 62.0]],   # large box (batch 1)
                     jnp.float32)
    y = jnp.array([1, 3, 5, 7], jnp.int32)

    outs = forward(params, x, y, bbox)
    for o in outs:
        jax.block_until_ready(o)
    print("KERNEL_OK")
</pallas_src>

<mosaic_0001>
module attributes {stable_mosaic.version = 11 : i64} {
  func.func @_mm_kernel(%arg0: i32, %arg1: i32, %arg2: i32, %arg3: memref<512x128xbf16, #tpu.memory_space<vmem>>, %arg4: memref<128x128xbf16, #tpu.memory_space<vmem>>, %arg5: memref<1x128xf32, #tpu.memory_space<vmem>>, %arg6: memref<512x128xbf16, #tpu.memory_space<vmem>>, %arg7: memref<512x128xf32, #tpu.memory_space<vmem>>) attributes {dimension_semantics = [#tpu.dimension_semantics<parallel>, #tpu.dimension_semantics<parallel>, #tpu.dimension_semantics<arbitrary>], iteration_bounds = array<i64: 1, 16, 1>, scalar_prefetch = 0 : i64, scratch_operands = 1 : i64, tpu.core_type = #tpu.core_type<tc>, window_params = [{transform_indices = @transform_0, window_bounds = array<i64: 512, 128>}, {transform_indices = @transform_1, window_bounds = array<i64: 128, 128>}, {transform_indices = @transform_2, window_bounds = array<i64: 1, 128>}, {transform_indices = @transform_3, window_bounds = array<i64: 512, 128>}]} {
    %c0_i32 = arith.constant 0 : i32
    %0 = arith.cmpi eq, %arg2, %c0_i32 : i32
    %1 = arith.extui %0 : i1 to i32
    %c0_i32_0 = arith.constant 0 : i32
    %2 = arith.cmpi ne, %1, %c0_i32_0 : i32
    scf.if %2 {
      %cst_10 = arith.constant 0.000000e+00 : f32
      %12 = vector.broadcast %cst_10 : f32 to vector<512x128xf32>
      %c0_11 = arith.constant 0 : index
      %c0_12 = arith.constant 0 : index
      %13 = vector.load %arg7[%c0_11, %c0_12] : memref<512x128xf32, #tpu.memory_space<vmem>>, vector<512x128xf32>
      tpu.vector_store %arg7[%c0_11, %c0_12], %12 {strides = array<i32>} : memref<512x128xf32, #tpu.memory_space<vmem>>, vector<512x128xf32>,
    } else {
    }
    %c0 = arith.constant 0 : index
    %c0_1 = arith.constant 0 : index
    %3 = vector.load %arg3[%c0, %c0_1] : memref<512x128xbf16, #tpu.memory_space<vmem>>, vector<512x128xbf16>
    %c0_2 = arith.constant 0 : index
    %c0_3 = arith.constant 0 : index
    %4 = vector.load %arg7[%c0_2, %c0_3] : memref<512x128xf32, #tpu.memory_space<vmem>>, vector<512x128xf32>
    %c0_4 = arith.constant 0 : index
    %c0_5 = arith.constant 0 : index
    %5 = vector.load %arg4[%c0_4, %c0_5] : memref<128x128xbf16, #tpu.memory_space<vmem>>, vector<128x128xbf16>
    %cst = arith.constant dense<0.000000e+00> : vector<512x128xf32>
    %6 = tpu.matmul %3, %5, %cst {dimension_numbers = #tpu.dot_dimension_numbers<[1], [0], [0], [1], [0, 0, 1, 1], [], []>} : vector<512x128xbf16>, vector<128x128xbf16>, vector<512x128xf32> -> vector<512x128xf32>
    %7 = arith.addf %4, %6 : vector<512x128xf32>
    %c0_6 = arith.constant 0 : index
    %c0_7 = arith.constant 0 : index
    %8 = vector.load %arg7[%c0_6, %c0_7] : memref<512x128xf32, #tpu.memory_space<vmem>>, vector<512x128xf32>
    tpu.vector_store %arg7[%c0_6, %c0_7], %7 {strides = array<i32>} : memref<512x128xf32, #tpu.memory_space<vmem>>, vector<512x128xf32>,
    %c0_i32_8 = arith.constant 0 : i32
    %9 = arith.cmpi eq, %arg2, %c0_i32_8 : i32
    %10 = arith.extui %9 : i1 to i32
    %c0_i32_9 = arith.constant 0 : i32
    %11 = arith.cmpi ne, %10, %c0_i32_9 : i32
    scf.if %11 {
      %c0_10 = arith.constant 0 : index
      %c0_11 = arith.constant 0 : index
      %12 = vector.load %arg7[%c0_10, %c0_11] : memref<512x128xf32, #tpu.memory_space<vmem>>, vector<512x128xf32>
      %c0_12 = arith.constant 0 : index
      %c0_13 = arith.constant 0 : index
      %13 = vector.load %arg5[%c0_12, %c0_13] : memref<1x128xf32, #tpu.memory_space<vmem>>, vector<1x128xf32>
      %14 = vector.broadcast %13 : vector<1x128xf32> to vector<512x128xf32>
      %15 = arith.addf %12, %14 : vector<512x128xf32>
      %cst_14 = arith.constant 0.000000e+00 : f32
      %16 = vector.broadcast %cst_14 : f32 to vector<512x128xf32>
      %17 = arith.maximumf %15, %16 : vector<512x128xf32>
      %18 = arith.truncf %17 : vector<512x128xf32> to vector<512x128xbf16>
      %c0_15 = arith.constant 0 : index
      %c0_16 = arith.constant 0 : index
      %19 = vector.load %arg6[%c0_15, %c0_16] : memref<512x128xbf16, #tpu.memory_space<vmem>>, vector<512x128xbf16>
      tpu.vector_store %arg6[%c0_15, %c0_16], %18 {strides = array<i32>} : memref<512x128xbf16, #tpu.memory_space<vmem>>, vector<512x128xbf16>,
    } else {
    }
    return
  }
  func.func @transform_0(%arg0: i32, %arg1: i32, %arg2: i32) -> (i32, i32) {
    %c0_i32 = arith.constant 0 : i32
    return %arg1, %arg2 : i32, i32
  }
  func.func @transform_1(%arg0: i32, %arg1: i32, %arg2: i32) -> (i32, i32) {
    %c0_i32 = arith.constant 0 : i32
    return %arg2, %arg0 : i32, i32
  }
  func.func @transform_2(%arg0: i32, %arg1: i32, %arg2: i32) -> (i32, i32) {
    %c0_i32 = arith.constant 0 : i32
    %c0_i32_0 = arith.constant 0 : i32
    return %c0_i32, %arg0 : i32, i32
  }
  func.func @transform_3(%arg0: i32, %arg1: i32, %arg2: i32) -> (i32, i32) {
    %c0_i32 = arith.constant 0 : i32
    return %arg1, %arg0 : i32, i32
  }
}

</mosaic_0001>

<bundles_post_ra>
// kernel: tpu_custom_call.1
= control target key start
LH: loop header
LB: loop body
LE: loop exit
PB: predicated region body
PF: predicated region fallthrough
CT: control target
= control target key end

     0   :  { %8 = vsyncpa [#allocation4], 0  ;;  %s2484_s0 = inlined_call_operand.hbm [shape: bf16[8192,128], index: 0, kind: input, shape index: {}]   ;;  %s2485_s1 = inlined_call_operand.hbm [shape: bf16[128,128], index: 1, kind: input, shape index: {}]   ;;  %s2486_s2 = inlined_call_operand.hbm [shape: f32[1,128], index: 2, kind: input, shape index: {}]   ;;  %s2487_s3 = inlined_call_operand.hbm [shape: bf16[8192,128], index: 3, kind: output, shape index: {}]  }
   0x1   :  { %10 = vsyncpa [#allocation4 + $0x1], 0 }
   0x2   :  { %11 = vsyncpa [#allocation7], 0 }
   0x3   :  { %12 = vsyncpa [#allocation5], 0 }
   0x4   :  { %14 = vsyncpa [#allocation5 + $0x1], 0  ;;  %s2199_s12 = smov 0   ;;  %s2201_s13 = smov 0  }
   0x5   :  { %s2203_s14 = smov 0   ;;  %s2205_s15 = smov 0  }
   0x6   :  { %s2207_s16 = smov 0   ;;  %s2209_s17 = smov 0  }
   0x7 LB: > { %s1471_s18 = sadd.s32 4294967295, %s2171_s17   ;;  %s1472_s19 = sadd.s32 4294967294, %s2171_s17   ;;  %s2171_s17 = sphi %s2209_s17, %s20_s17   ;;  %s2167_s16 = sphi %s2207_s16, %s2497_s16   ;;  %s2163_s15 = sphi %s2205_s15, %s2496_s15   ;;  %s2159_s14 = sphi %s2203_s14, %s2495_s14   ;;  %s2155_s13 = sphi %s2201_s13, %s2494_s13   ;;  %s2151_s12 = sphi %s2199_s12, %s2493_s12  }
   0x8   : > { %p61_p0 = scmp.ne.s32.totalorder %s2155_s13, %s2151_s12  ;;  %p2233_p1 = scmp.eq.s32.totalorder %s1471_s18, 0 }
   0x9   : > { %p147_p2 = scmp.eq.s32.totalorder %s1472_s19, 15  ;;  %p1473_p4 = scmp.ge.s32.totalorder %s2171_s17, 1 }
   0xa   : > { %p2239_p3 = por %p2233_p1, %p61_p0  ;;  %p154_p6 = scmp.lt.s32.totalorder %s2171_s17, 17 }
   0xb   : > { %p2244_p5 = por %p147_p2, %p61_p0  ;;  %s169_s25 = sshll.u32 %s2485_s1, 4  ;;  %s170_s25 = int_to_ptr.hbm [resolvable:$true] %s169_s25 }
   0xc   : > { %p2252_p7 = pnand %p1473_p4, %p154_p6  ;;  %s2173_s27 = smov [#allocation6]  }
   0xd   : > { %s171_s28 = sshll.u32 %s2173_s27, 4  ;;  %s185_s4 = sshll.u32 %s2486_s2, 4  ;;  %s172_s28 = int_to_ptr.vmem [resolvable:$true] %s171_s28  ;;  %s186_s4 = int_to_ptr.hbm [resolvable:$true] %s185_s4 }
   0xe   : > { %p1919_p8 = pneg %p2252_p7  ;;  %s2174_s5 = smov 64  }
   0xf   : > { %s2175_s6 = smov 4   ;;  %s2176_s7 = smov [#allocation8]  }
  0x10   : > { %p1920_p9 = pnand %p1919_p8, %p2233_p1  ;;  %s187_s8 = sshll.u32 %s2176_s7, 4  ;;  %s188_s8 = int_to_ptr.vmem [resolvable:$true] %s187_s8 }
  0x11   : > { %p141_p10 = scmp.eq.s32.totalorder %s1471_s18, 15  ;;  %s35_s9 = sadd.s32 1, %s2167_s16 }
  0x12   : > { %1922 = dma.hbm_to_vmem [thread:$0]  (!%p1920_p9), %s170_s25, 1024, %s172_s28, [#allocation7], %s2174_s5, %s2174_s5, %s2175_s6  }
  0x13   : > { %1925 = dma.hbm_to_vmem [thread:$0]  (!%p1920_p9), %s186_s4, 16, %s188_s8, [#allocation7]  }
  0x14   : > { %p37_p11 = scmp.ge.s32.totalorder %s35_s9, 16  ;;  %s48_s10 = sadd.s32 1, %s2159_s14 }
  0x15   : > { %p55_p12 = scmp.ne.s32.totalorder %s2159_s14, %s2155_s13  ;;  %p56_p13 = scmp.eq.s32.totalorder %s2171_s17, 0 }
  0x16   : > { %s2499_s9 = smov (%p37_p11, %s35_s9), 0  ;;  %p1936_p2 = scmp.lt.s32.totalorder %s2171_s17, 16 }
  0x17   : > { %p2273_p0 = por %p141_p10, %p55_p12  ;;  %s43_s19 = ssub.s32 %s2167_s16, %s2499_s9 }
  0x18   : > { %s198_s23 = sand.u32 1, %s2159_s14   ;;  %p46_p4 = scmp.eq.s32.totalorder %s43_s19, 0 }
  0x19   : > { %p57_p6 = por %p56_p13, %p55_p12  ;;  %s1477_s24 = sshll.u32 %s198_s23, 8 }
  0x1a   : > { %s1650_s18 = sshll.u32 %s2167_s16, 8  ;;  %s202_s4 = scalar_lea.vmem [#allocation3], %s1477_s24 }
  0x1b   : > { %s2283_s25 = scalar_select %p46_p4, %s2159_s14, %s48_s10  }
  0x1c   : > { %s208_s29 = scalar_lea.hbm %s2484_s0, %s1650_s18  ;;  %s211_s7 = sshll.u32 %s202_s4, 4  ;;  %s212_s7 = int_to_ptr.vmem [resolvable:$true] %s211_s7 }
  0x1d   : > { %s209_s30 = sshll.u32 %s208_s29, 4  ;;  %p1927_p8 = pnand %p1936_p2, %p57_p6  ;;  %s210_s30 = int_to_ptr.hbm [resolvable:$true] %s209_s30 }
  0x1e   : > { %s199_s8 = scalar_lea.sflag [#allocation4], %s198_s23  ;;  %223 = sbr.rel (%p2252_p7) target bundleno = 334 (0x14e), region = 32 }
  0x1f   : > { %1929 = dma.hbm_to_vmem [thread:$0]  (!%p1927_p8), %s210_s30, 4096, %s212_s7, %s199_s8, %s2174_s5, %s2174_s5, %s2175_s6  }
  0x20   : > { %s2296_s10 = sand.u32 (!%p2252_p7), 1, %s2155_s13  }
  0x21   : > { %s1481_s19 = sshll.u32 (!%p2252_p7), %s2296_s10, 8  ;;  %s226_s24 = scalar_lea.sflag (!%p2252_p7), [#allocation4], %s2296_s10 }
  0x22   : > { %s2302_s18 = scalar_lea.vmem (!%p2252_p7), [#allocation3], %s1481_s19 }
  0x23   : > { %2138 = dma.done.wait (%p2239_p3), %s226_s24, 4096  }
  0x24   : > { %2140 = vsyncadd (%p2239_p3), %s226_s24, 4294963200 }
  0x25   : > { %2142 = dma.done.wait (%p2233_p1), [#allocation7], 1040  }
  0x26   : > { %2144 = vsyncadd (%p2233_p1), [#allocation7], 4294966256  ;;  %v1690_v0 = vld [vmem:[#allocation6 + $0x38] sm:$0xff]  ;;  %v1689_v1 = vld [vmem:[#allocation6 + $0x30] sm:$0xff]  ;;  %s2354_s20 = scalar_lea.vmem [#allocation9], %s1481_s19  ;;  %s1691_s21 = sshll.u32 %s2163_s15, 8 }
  0x27   : > { %718 = vmatpush.bf16.msra.mxu0 %v1690_v0  ;;  %1883 = vmatpush.bf16.msra.mxu1 %v1690_v0  ;;  %v1688_v2 = vld [vmem:[#allocation6 + $0x28] sm:$0xff]  ;;  %v1687_v3 = vld [vmem:[#allocation6 + $0x20] sm:$0xff]  ;;  %v1686_v4 = vld [vmem:[#allocation6 + $0x18] sm:$0xff]  ;;  %s1355_s6 = scalar_lea.hbm %s2487_s3, %s1691_s21  ;;  %s1356_s15 = sshll.u32 %s2354_s20, 4  ;;  %s1357_s15 = int_to_ptr.vmem [resolvable:$true] %s1356_s15 }
  0x28   : > { %1884 = vmatpush.bf16.msra.mxu2 %v1690_v0  ;;  %1885 = vmatpush.bf16.msra.mxu3 %v1690_v0  ;;  %v1685_v5 = vld [vmem:[#allocation6 + $0x10] sm:$0xff]  ;;  %v1684_v6 = vld [vmem:[#allocation6 + $0x8] sm:$0xff]  ;;  %v1683_v7 = vld [vmem:[#allocation6] sm:$0xff]  ;;  %s1358_s23 = sshll.u32 %s1355_s6, 4  ;;  %s1343_s27 = scalar_lea.sflag [#allocation5], %s2296_s10  ;;  %s1359_s23 = int_to_ptr.hbm [resolvable:$true] %s1358_s23 }
  0x29   : > { %v1651_v8 = vld [vmem:[%s2302_s18] sm:$0xff]  ;;  %v1652_v12 = vld [vmem:[%s2302_s18 + $0x8] sm:$0xff]  ;;  %v1653_v16 = vld [vmem:[%s2302_s18 + $0x10] sm:$0xff]  ;;  %s2099_s28 = sshra.s32 %s1359_s23, 4  ;;  %s2105_s7 = scalar_lea.hbm %s2487_s3, 4096  ;;  %s2100_s28 = int_to_ptr.hbm [resolvable:$true] %s2099_s28 }
  0x2a   : > { %v1659_v9 = vld [vmem:[%s2302_s18 + $0x40] sm:$0xff]  ;;  %v1660_v13 = vld [vmem:[%s2302_s18 + $0x48] sm:$0xff]  ;;  %v1661_v17 = vld [vmem:[%s2302_s18 + $0x50] sm:$0xff]  ;;  %s2101_s29 = scalar_lea.hbm %s2100_s28, 256  ;;  %p2106_p9 = scmp.lt.s32.totalorder %s2100_s28, %s2487_s3 }
  0x2b   : > { %719 = vmatpush.bf16.msra.mxu0 %v1689_v1  ;;  %1886 = vmatpush.bf16.msra.mxu1 %v1689_v1  ;;  %v1667_v10 = vld [vmem:[%s2302_s18 + $0x80] sm:$0xff]  ;;  %v1668_v14 = vld [vmem:[%s2302_s18 + $0x88] sm:$0xff]  ;;  %v1669_v18 = vld [vmem:[%s2302_s18 + $0x90] sm:$0xff]  ;;  %p2102_p1 = scmp.ne.s32.totalorder %s2100_s28, %s2101_s29  ;;  %p2107_p10 = scmp.lt.s32.totalorder %s2105_s7, %s2101_s29 }
  0x2c   : > { %1887 = vmatpush.bf16.msra.mxu2 %v1689_v1  ;;  %1888 = vmatpush.bf16.msra.mxu3 %v1689_v1  ;;  %v1675_v11 = vld [vmem:[%s2302_s18 + $0xc0] sm:$0xff]  ;;  %v1676_v15 = vld [vmem:[%s2302_s18 + $0xc8] sm:$0xff]  ;;  %v1677_v19 = vld [vmem:[%s2302_s18 + $0xd0] sm:$0xff] }
  0x2d   : > { %v1654_v20 = vld [vmem:[%s2302_s18 + $0x18] sm:$0xff]  ;;  %v1655_v24 = vld [vmem:[%s2302_s18 + $0x20] sm:$0xff]  ;;  %v1656_v28 = vld [vmem:[%s2302_s18 + $0x28] sm:$0xff]  ;;  %p2103_p3 = pnand %p2102_p1, %p2273_p0  ;;  %p2108_p11 = por %p2107_p10, %p2106_p9 }
  0x2e   : > { %v1662_v21 = vld [vmem:[%s2302_s18 + $0x58] sm:$0xff]  ;;  %v1663_v25 = vld [vmem:[%s2302_s18 + $0x60] sm:$0xff]  ;;  %v1664_v29 = vld [vmem:[%s2302_s18 + $0x68] sm:$0xff] }
  0x2f   : > { %720 = vmatpush.bf16.msra.mxu0 %v1688_v2  ;;  %1889 = vmatpush.bf16.msra.mxu1 %v1688_v2  ;;  %v1670_v22 = vld [vmem:[%s2302_s18 + $0x98] sm:$0xff]  ;;  %v1671_v26 = vld [vmem:[%s2302_s18 + $0xa0] sm:$0xff]  ;;  %v1672_v30 = vld [vmem:[%s2302_s18 + $0xa8] sm:$0xff]  ;;  %p2104_p7 = pneg %p2103_p3 }
  0x30   : > { %1890 = vmatpush.bf16.msra.mxu2 %v1688_v2  ;;  %1891 = vmatpush.bf16.msra.mxu3 %v1688_v2  ;;  %v1678_v23 = vld [vmem:[%s2302_s18 + $0xd8] sm:$0xff]  ;;  %v1679_v27 = vld [vmem:[%s2302_s18 + $0xe0] sm:$0xff]  ;;  %v1680_v31 = vld [vmem:[%s2302_s18 + $0xe8] sm:$0xff] }
  0x31   : > { %v1657_v32 = vld [vmem:[%s2302_s18 + $0x30] sm:$0xff]  ;;  %v1658_v36 = vld [vmem:[%s2302_s18 + $0x38] sm:$0xff]  ;;  %v2344_v42 = vld [vmem:[#allocation8] ss:$0 sm:$0xff]  ;;  %p2109_p12 = pnand %p2108_p11, %p2104_p7 }
  0x32   : > { %v1665_v33 = vld [vmem:[%s2302_s18 + $0x70] sm:$0xff]  ;;  %v1666_v37 = vld [vmem:[%s2302_s18 + $0x78] sm:$0xff] }
  0x33   : > { %721 = vmatpush.bf16.msra.mxu0 %v1687_v3  ;;  %1892 = vmatpush.bf16.msra.mxu1 %v1687_v3  ;;  %v1673_v34 = vld [vmem:[%s2302_s18 + $0xb0] sm:$0xff]  ;;  %v1674_v38 = vld [vmem:[%s2302_s18 + $0xb8] sm:$0xff] }
  0x34   : > { %1893 = vmatpush.bf16.msra.mxu2 %v1687_v3  ;;  %1894 = vmatpush.bf16.msra.mxu3 %v1687_v3  ;;  %v1681_v35 = vld [vmem:[%s2302_s18 + $0xf0] sm:$0xff]  ;;  %v1682_v39 = vld [vmem:[%s2302_s18 + $0xf8] sm:$0xff] }
  0x37   : > { %722 = vmatpush.bf16.msra.mxu0 %v1686_v4  ;;  %1895 = vmatpush.bf16.msra.mxu1 %v1686_v4 }
  0x38   : > { %1896 = vmatpush.bf16.msra.mxu2 %v1686_v4  ;;  %1897 = vmatpush.bf16.msra.mxu3 %v1686_v4 }
  0x3b   : > { %723 = vmatpush.bf16.msra.mxu0 %v1685_v5  ;;  %1898 = vmatpush.bf16.msra.mxu1 %v1685_v5 }
  0x3c   : > { %1899 = vmatpush.bf16.msra.mxu2 %v1685_v5  ;;  %1900 = vmatpush.bf16.msra.mxu3 %v1685_v5 }
  0x3f   : > { %724 = vmatpush.bf16.msra.mxu0 %v1684_v6  ;;  %1901 = vmatpush.bf16.msra.mxu1 %v1684_v6 }
  0x40   : > { %1902 = vmatpush.bf16.msra.mxu2 %v1684_v6  ;;  %1903 = vmatpush.bf16.msra.mxu3 %v1684_v6 }
  0x43   : > { %725 = vmatpush.bf16.msra.mxu0 %v1683_v7  ;;  %1904 = vmatpush.bf16.msra.mxu1 %v1683_v7 }
  0x44   : > { %1905 = vmatpush.bf16.msra.mxu2 %v1683_v7  ;;  %1906 = vmatpush.bf16.msra.mxu3 %v1683_v7 }
  0x46   : > { %726 = vmatmul.bf16.vlgmr.msra.gmra.mxu0 %v1651_v8  ;;  %766 = vmatmul.bf16.vlgmr.msra.gmra.mxu1 %v1659_v9 }
  0x47   : > { %806 = vmatmul.bf16.vlgmr.msra.gmra.mxu2 %v1667_v10  ;;  %846 = vmatmul.bf16.vlgmr.msra.gmra.mxu3 %v1675_v11 }
  0x56   : > { %731 = vmatmul.bf16.gmra.mxu0 %v1652_v12  ;;  %771 = vmatmul.bf16.gmra.mxu1 %v1660_v13 }
  0x57   : > { %811 = vmatmul.bf16.gmra.mxu2 %v1668_v14  ;;  %851 = vmatmul.bf16.gmra.mxu3 %v1676_v15 }
  0x66   : > { %736 = vmatmul.bf16.gmra.mxu0 %v1653_v16  ;;  %776 = vmatmul.bf16.gmra.mxu1 %v1661_v17 }
  0x67   : > { %816 = vmatmul.bf16.gmra.mxu2 %v1669_v18  ;;  %856 = vmatmul.bf16.gmra.mxu3 %v1677_v19 }
  0x76   : > { %741 = vmatmul.bf16.gmra.mxu0 %v1654_v20  ;;  %781 = vmatmul.bf16.gmra.mxu1 %v1662_v21 }
  0x77   : > { %821 = vmatmul.bf16.gmra.mxu2 %v1670_v22  ;;  %861 = vmatmul.bf16.gmra.mxu3 %v1678_v23 }
  0x86   : > { %746 = vmatmul.bf16.gmra.mxu0 %v1655_v24  ;;  %786 = vmatmul.bf16.gmra.mxu1 %v1663_v25 }
  0x87   : > { %826 = vmatmul.bf16.gmra.mxu2 %v1671_v26  ;;  %866 = vmatmul.bf16.gmra.mxu3 %v1679_v27 }
  0x96   : > { %751 = vmatmul.bf16.gmra.mxu0 %v1656_v28  ;;  %791 = vmatmul.bf16.gmra.mxu1 %v1664_v29 }
  0x97   : > { %831 = vmatmul.bf16.gmra.mxu2 %v1672_v30  ;;  %871 = vmatmul.bf16.gmra.mxu3 %v1680_v31 }
  0xa6   : > { %756 = vmatmul.bf16.gmra.mxu0 %v1657_v32  ;;  %796 = vmatmul.bf16.gmra.mxu1 %v1665_v33 }
  0xa7   : > { %836 = vmatmul.bf16.gmra.mxu2 %v1673_v34  ;;  %876 = vmatmul.bf16.gmra.mxu3 %v1681_v35 }
  0xb6   : > { %761 = vmatmul.bf16.gmra.mxu0 %v1658_v36  ;;  %801 = vmatmul.bf16.gmra.mxu1 %v1666_v37 }
  0xb7   : > { %841 = vmatmul.bf16.gmra.mxu2 %v1674_v38  ;;  %881 = vmatmul.bf16.gmra.mxu3 %v1682_v39 }
  0xc3   : > { %v727_v40 = vpop.f32.mrf.mxu0  ;;  %v767_v41 = vpop.f32.mrf.mxu1 }
  0xc4   : > { %v1086_v43 = vadd.f32 %v2344_v42, %v727_v40  ;;  %v1102_v44 = vadd.f32 %v2344_v42, %v767_v41 }
  0xc6   : > { %v1150_v51 = vmax.f32 %v1086_v43, 0.0  ;;  %v1166_v52 = vmax.f32 %v1102_v44, 0.0 }
  0xca   : > { %v807_v45 = vpop.f32.mrf.mxu2  ;;  %v847_v46 = vpop.f32.mrf.mxu3 }
  0xcb   : > { %v729_v47 = vpop.f32.mrf.mxu0  ;;  %v769_v48 = vpop.f32.mrf.mxu1  ;;  %v1118_v57 = vadd.f32 %v2344_v42, %v807_v45  ;;  %v1134_v58 = vadd.f32 %v2344_v42, %v847_v46 }
  0xcc   : > { %v1087_v49 = vadd.f32 %v2344_v42, %v729_v47  ;;  %v1103_v50 = vadd.f32 %v2344_v42, %v769_v48 }
  0xcd   : > { %v1182_v1 = vmax.f32 %v1118_v57, 0.0  ;;  %v1198_v2 = vmax.f32 %v1134_v58, 0.0 }
  0xce   : > { %v1151_v53 = vmax.f32 %v1087_v49, 0.0  ;;  %v1167_v54 = vmax.f32 %v1103_v50, 0.0 }
  0xd0   : > { %v1695_v55 = vpack.c.bf16 %v1151_v53, %v1150_v51  ;;  %v1735_v56 = vpack.c.bf16 %v1167_v54, %v1166_v52 }
  0xd2   : > { %1696 = vst [vmem:[%s2354_s20] sm:$0xff] %v1695_v55   ;;  %v809_v59 = vpop.f32.mrf.mxu2  ;;  %v849_v60 = vpop.f32.mrf.mxu3 }
  0xd3   : > { %1859 = vst [vmem:[%s2354_s20 + $0x40] sm:$0xff] %v1735_v56   ;;  %v1119_v61 = vadd.f32 %v2344_v42, %v809_v59  ;;  %v1135_v62 = vadd.f32 %v2344_v42, %v849_v60  ;;  %v732_v63 = vpop.f32.mrf.mxu0  ;;  %v772_v0 = vpop.f32.mrf.mxu1 }
  0xd4   : > { %v1088_v7 = vadd.f32 %v2344_v42, %v732_v63  ;;  %v1104_v8 = vadd.f32 %v2344_v42, %v772_v0 }
  0xd5   : > { %v1183_v3 = vmax.f32 %v1119_v61, 0.0  ;;  %v1199_v4 = vmax.f32 %v1135_v62, 0.0 }
  0xd6   : > { %v1152_v15 = vmax.f32 %v1088_v7, 0.0  ;;  %v1168_v16 = vmax.f32 %v1104_v8, 0.0 }
  0xd7   : > { %v1775_v5 = vpack.c.bf16 %v1183_v3, %v1182_v1  ;;  %v1815_v6 = vpack.c.bf16 %v1199_v4, %v1198_v2 }
  0xd9   : > { %1867 = vst [vmem:[%s2354_s20 + $0x80] sm:$0xff] %v1775_v5  }
  0xda   : > { %1875 = vst [vmem:[%s2354_s20 + $0xc0] sm:$0xff] %v1815_v6   ;;  %v812_v9 = vpop.f32.mrf.mxu2  ;;  %v852_v10 = vpop.f32.mrf.mxu3 }
  0xdb   : > { %v734_v11 = vpop.f32.mrf.mxu0  ;;  %v774_v12 = vpop.f32.mrf.mxu1  ;;  %v1120_v21 = vadd.f32 %v2344_v42, %v812_v9  ;;  %v1136_v22 = vadd.f32 %v2344_v42, %v852_v10 }
  0xdc   : > { %v1089_v13 = vadd.f32 %v2344_v42, %v734_v11  ;;  %v1105_v14 = vadd.f32 %v2344_v42, %v774_v12 }
  0xdd   : > { %v1184_v29 = vmax.f32 %v1120_v21, 0.0  ;;  %v1200_v30 = vmax.f32 %v1136_v22, 0.0 }
  0xde   : > { %v1153_v17 = vmax.f32 %v1089_v13, 0.0  ;;  %v1169_v18 = vmax.f32 %v1105_v14, 0.0 }
  0xe0   : > { %v1700_v19 = vpack.c.bf16 %v1153_v17, %v1152_v15  ;;  %v1740_v20 = vpack.c.bf16 %v1169_v18, %v1168_v16 }
  0xe2   : > { %1852 = vst [vmem:[%s2354_s20 + $0x8] sm:$0xff] %v1700_v19   ;;  %v814_v23 = vpop.f32.mrf.mxu2  ;;  %v854_v24 = vpop.f32.mrf.mxu3 }
  0xe3   : > { %1860 = vst [vmem:[%s2354_s20 + $0x48] sm:$0xff] %v1740_v20   ;;  %v1121_v25 = vadd.f32 %v2344_v42, %v814_v23  ;;  %v1137_v26 = vadd.f32 %v2344_v42, %v854_v24  ;;  %v737_v27 = vpop.f32.mrf.mxu0  ;;  %v777_v28 = vpop.f32.mrf.mxu1 }
  0xe4   : > { %v1090_v35 = vadd.f32 %v2344_v42, %v737_v27  ;;  %v1106_v36 = vadd.f32 %v2344_v42, %v777_v28 }
  0xe5   : > { %v1185_v31 = vmax.f32 %v1121_v25, 0.0  ;;  %v1201_v32 = vmax.f32 %v1137_v26, 0.0 }
  0xe6   : > { %v1154_v44 = vmax.f32 %v1090_v35, 0.0  ;;  %v1170_v45 = vmax.f32 %v1106_v36, 0.0 }
  0xe7   : > { %v1780_v33 = vpack.c.bf16 %v1185_v31, %v1184_v29  ;;  %v1820_v34 = vpack.c.bf16 %v1201_v32, %v1200_v30 }
  0xe9   : > { %1868 = vst [vmem:[%s2354_s20 + $0x88] sm:$0xff] %v1780_v33  }
  0xea   : > { %1876 = vst [vmem:[%s2354_s20 + $0xc8] sm:$0xff] %v1820_v34   ;;  %v817_v37 = vpop.f32.mrf.mxu2  ;;  %v857_v38 = vpop.f32.mrf.mxu3 }
  0xeb   : > { %v739_v39 = vpop.f32.mrf.mxu0  ;;  %v779_v40 = vpop.f32.mrf.mxu1  ;;  %v1122_v50 = vadd.f32 %v2344_v42, %v817_v37  ;;  %v1138_v51 = vadd.f32 %v2344_v42, %v857_v38 }
  0xec   : > { %v1091_v41 = vadd.f32 %v2344_v42, %v739_v39  ;;  %v1107_v43 = vadd.f32 %v2344_v42, %v779_v40 }
  0xed   : > { %v1186_v58 = vmax.f32 %v1122_v50, 0.0  ;;  %v1202_v59 = vmax.f32 %v1138_v51, 0.0 }
  0xee   : > { %v1155_v46 = vmax.f32 %v1091_v41, 0.0  ;;  %v1171_v47 = vmax.f32 %v1107_v43, 0.0 }
  0xf0   : > { %v1705_v48 = vpack.c.bf16 %v1155_v46, %v1154_v44  ;;  %v1745_v49 = vpack.c.bf16 %v1171_v47, %v1170_v45 }
  0xf2   : > { %1853 = vst [vmem:[%s2354_s20 + $0x10] sm:$0xff] %v1705_v48   ;;  %v819_v52 = vpop.f32.mrf.mxu2  ;;  %v859_v53 = vpop.f32.mrf.mxu3 }
  0xf3   : > { %1861 = vst [vmem:[%s2354_s20 + $0x50] sm:$0xff] %v1745_v49   ;;  %v1123_v54 = vadd.f32 %v2344_v42, %v819_v52  ;;  %v1139_v55 = vadd.f32 %v2344_v42, %v859_v53  ;;  %v742_v56 = vpop.f32.mrf.mxu0  ;;  %v782_v57 = vpop.f32.mrf.mxu1 }
  0xf4   : > { %v1092_v0 = vadd.f32 %v2344_v42, %v742_v56  ;;  %v1108_v1 = vadd.f32 %v2344_v42, %v782_v57 }
  0xf5   : > { %v1187_v60 = vmax.f32 %v1123_v54, 0.0  ;;  %v1203_v61 = vmax.f32 %v1139_v55, 0.0 }
  0xf6   : > { %v1156_v8 = vmax.f32 %v1092_v0, 0.0  ;;  %v1172_v9 = vmax.f32 %v1108_v1, 0.0 }
  0xf7   : > { %v1785_v62 = vpack.c.bf16 %v1187_v60, %v1186_v58  ;;  %v1825_v63 = vpack.c.bf16 %v1203_v61, %v1202_v59 }
  0xf9   : > { %1869 = vst [vmem:[%s2354_s20 + $0x90] sm:$0xff] %v1785_v62  }
  0xfa   : > { %1877 = vst [vmem:[%s2354_s20 + $0xd0] sm:$0xff] %v1825_v63   ;;  %v822_v2 = vpop.f32.mrf.mxu2  ;;  %v862_v3 = vpop.f32.mrf.mxu3 }
  0xfb   : > { %v744_v4 = vpop.f32.mrf.mxu0  ;;  %v784_v5 = vpop.f32.mrf.mxu1  ;;  %v1124_v14 = vadd.f32 %v2344_v42, %v822_v2  ;;  %v1140_v15 = vadd.f32 %v2344_v42, %v862_v3 }
  0xfc   : > { %v1093_v6 = vadd.f32 %v2344_v42, %v744_v4  ;;  %v1109_v7 = vadd.f32 %v2344_v42, %v784_v5 }
  0xfd   : > { %v1188_v22 = vmax.f32 %v1124_v14, 0.0  ;;  %v1204_v23 = vmax.f32 %v1140_v15, 0.0 }
  0xfe   : > { %v1157_v10 = vmax.f32 %v1093_v6, 0.0  ;;  %v1173_v11 = vmax.f32 %v1109_v7, 0.0 }
 0x100   : > { %v1710_v12 = vpack.c.bf16 %v1157_v10, %v1156_v8  ;;  %v1750_v13 = vpack.c.bf16 %v1173_v11, %v1172_v9 }
 0x102   : > { %1854 = vst [vmem:[%s2354_s20 + $0x18] sm:$0xff] %v1710_v12   ;;  %v824_v16 = vpop.f32.mrf.mxu2  ;;  %v864_v17 = vpop.f32.mrf.mxu3 }
 0x103   : > { %1862 = vst [vmem:[%s2354_s20 + $0x58] sm:$0xff] %v1750_v13   ;;  %v1125_v18 = vadd.f32 %v2344_v42, %v824_v16  ;;  %v1141_v19 = vadd.f32 %v2344_v42, %v864_v17  ;;  %v747_v20 = vpop.f32.mrf.mxu0  ;;  %v787_v21 = vpop.f32.mrf.mxu1 }
 0x104   : > { %v1094_v28 = vadd.f32 %v2344_v42, %v747_v20  ;;  %v1110_v29 = vadd.f32 %v2344_v42, %v787_v21 }
 0x105   : > { %v1189_v24 = vmax.f32 %v1125_v18, 0.0  ;;  %v1205_v25 = vmax.f32 %v1141_v19, 0.0 }
 0x106   : > { %v1158_v36 = vmax.f32 %v1094_v28, 0.0  ;;  %v1174_v37 = vmax.f32 %v1110_v29, 0.0 }
 0x107   : > { %v1790_v26 = vpack.c.bf16 %v1189_v24, %v1188_v22  ;;  %v1830_v27 = vpack.c.bf16 %v1205_v25, %v1204_v23 }
 0x109   : > { %1870 = vst [vmem:[%s2354_s20 + $0x98] sm:$0xff] %v1790_v26  }
 0x10a   : > { %1878 = vst [vmem:[%s2354_s20 + $0xd8] sm:$0xff] %v1830_v27   ;;  %v827_v30 = vpop.f32.mrf.mxu2  ;;  %v867_v31 = vpop.f32.mrf.mxu3 }
 0x10b   : > { %v749_v32 = vpop.f32.mrf.mxu0  ;;  %v789_v33 = vpop.f32.mrf.mxu1  ;;  %v1126_v43 = vadd.f32 %v2344_v42, %v827_v30  ;;  %v1142_v44 = vadd.f32 %v2344_v42, %v867_v31 }
 0x10c   : > { %v1095_v34 = vadd.f32 %v2344_v42, %v749_v32  ;;  %v1111_v35 = vadd.f32 %v2344_v42, %v789_v33 }
 0x10d   : > { %v1190_v51 = vmax.f32 %v1126_v43, 0.0  ;;  %v1206_v52 = vmax.f32 %v1142_v44, 0.0 }
 0x10e   : > { %v1159_v38 = vmax.f32 %v1095_v34, 0.0  ;;  %v1175_v39 = vmax.f32 %v1111_v35, 0.0 }
 0x110   : > { %v1715_v40 = vpack.c.bf16 %v1159_v38, %v1158_v36  ;;  %v1755_v41 = vpack.c.bf16 %v1175_v39, %v1174_v37 }
 0x112   : > { %1855 = vst [vmem:[%s2354_s20 + $0x20] sm:$0xff] %v1715_v40   ;;  %v829_v45 = vpop.f32.mrf.mxu2  ;;  %v869_v46 = vpop.f32.mrf.mxu3 }
 0x113   : > { %1863 = vst [vmem:[%s2354_s20 + $0x60] sm:$0xff] %v1755_v41   ;;  %v1127_v47 = vadd.f32 %v2344_v42, %v829_v45  ;;  %v1143_v48 = vadd.f32 %v2344_v42, %v869_v46  ;;  %v752_v49 = vpop.f32.mrf.mxu0  ;;  %v792_v50 = vpop.f32.mrf.mxu1 }
 0x114   : > { %v1096_v57 = vadd.f32 %v2344_v42, %v752_v49  ;;  %v1112_v58 = vadd.f32 %v2344_v42, %v792_v50 }
 0x115   : > { %v1191_v53 = vmax.f32 %v1127_v47, 0.0  ;;  %v1207_v54 = vmax.f32 %v1143_v48, 0.0 }
 0x116   : > { %v1160_v1 = vmax.f32 %v1096_v57, 0.0  ;;  %v1176_v2 = vmax.f32 %v1112_v58, 0.0 }
 0x117   : > { %v1795_v55 = vpack.c.bf16 %v1191_v53, %v1190_v51  ;;  %v1835_v56 = vpack.c.bf16 %v1207_v54, %v1206_v52 }
 0x119   : > { %1871 = vst [vmem:[%s2354_s20 + $0xa0] sm:$0xff] %v1795_v55  }
 0x11a   : > { %1879 = vst [vmem:[%s2354_s20 + $0xe0] sm:$0xff] %v1835_v56   ;;  %v832_v59 = vpop.f32.mrf.mxu2  ;;  %v872_v60 = vpop.f32.mrf.mxu3 }
 0x11b   : > { %v754_v61 = vpop.f32.mrf.mxu0  ;;  %v794_v62 = vpop.f32.mrf.mxu1  ;;  %v1128_v7 = vadd.f32 %v2344_v42, %v832_v59  ;;  %v1144_v8 = vadd.f32 %v2344_v42, %v872_v60 }
 0x11c   : > { %v1097_v63 = vadd.f32 %v2344_v42, %v754_v61  ;;  %v1113_v0 = vadd.f32 %v2344_v42, %v794_v62 }
 0x11d   : > { %v1192_v15 = vmax.f32 %v1128_v7, 0.0  ;;  %v1208_v16 = vmax.f32 %v1144_v8, 0.0 }
 0x11e   : > { %v1161_v3 = vmax.f32 %v1097_v63, 0.0  ;;  %v1177_v4 = vmax.f32 %v1113_v0, 0.0 }
 0x120   : > { %v1720_v5 = vpack.c.bf16 %v1161_v3, %v1160_v1  ;;  %v1760_v6 = vpack.c.bf16 %v1177_v4, %v1176_v2 }
 0x122   : > { %1856 = vst [vmem:[%s2354_s20 + $0x28] sm:$0xff] %v1720_v5   ;;  %v834_v9 = vpop.f32.mrf.mxu2  ;;  %v874_v10 = vpop.f32.mrf.mxu3 }
 0x123   : > { %1864 = vst [vmem:[%s2354_s20 + $0x68] sm:$0xff] %v1760_v6   ;;  %v1129_v11 = vadd.f32 %v2344_v42, %v834_v9  ;;  %v1145_v12 = vadd.f32 %v2344_v42, %v874_v10  ;;  %v757_v13 = vpop.f32.mrf.mxu0  ;;  %v797_v14 = vpop.f32.mrf.mxu1 }
 0x124   : > { %v1098_v21 = vadd.f32 %v2344_v42, %v757_v13  ;;  %v1114_v22 = vadd.f32 %v2344_v42, %v797_v14 }
 0x125   : > { %v1193_v17 = vmax.f32 %v1129_v11, 0.0  ;;  %v1209_v18 = vmax.f32 %v1145_v12, 0.0 }
 0x126   : > { %v1162_v29 = vmax.f32 %v1098_v21, 0.0  ;;  %v1178_v30 = vmax.f32 %v1114_v22, 0.0 }
 0x127   : > { %v1800_v19 = vpack.c.bf16 %v1193_v17, %v1192_v15  ;;  %v1840_v20 = vpack.c.bf16 %v1209_v18, %v1208_v16 }
 0x129   : > { %1872 = vst [vmem:[%s2354_s20 + $0xa8] sm:$0xff] %v1800_v19  }
 0x12a   : > { %1880 = vst [vmem:[%s2354_s20 + $0xe8] sm:$0xff] %v1840_v20   ;;  %v837_v23 = vpop.f32.mrf.mxu2  ;;  %v877_v24 = vpop.f32.mrf.mxu3 }
 0x12b   : > { %v759_v25 = vpop.f32.mrf.mxu0  ;;  %v799_v26 = vpop.f32.mrf.mxu1  ;;  %v1130_v35 = vadd.f32 %v2344_v42, %v837_v23  ;;  %v1146_v36 = vadd.f32 %v2344_v42, %v877_v24 }
 0x12c   : > { %v1099_v27 = vadd.f32 %v2344_v42, %v759_v25  ;;  %v1115_v28 = vadd.f32 %v2344_v42, %v799_v26 }
 0x12d   : > { %v1194_v44 = vmax.f32 %v1130_v35, 0.0  ;;  %v1210_v45 = vmax.f32 %v1146_v36, 0.0 }
 0x12e   : > { %v1163_v31 = vmax.f32 %v1099_v27, 0.0  ;;  %v1179_v32 = vmax.f32 %v1115_v28, 0.0 }
 0x130   : > { %v1725_v33 = vpack.c.bf16 %v1163_v31, %v1162_v29  ;;  %v1765_v34 = vpack.c.bf16 %v1179_v32, %v1178_v30 }
 0x132   : > { %1857 = vst [vmem:[%s2354_s20 + $0x30] sm:$0xff] %v1725_v33   ;;  %v839_v37 = vpop.f32.mrf.mxu2  ;;  %v879_v38 = vpop.f32.mrf.mxu3 }
 0x133   : > { %1865 = vst [vmem:[%s2354_s20 + $0x70] sm:$0xff] %v1765_v34   ;;  %v1131_v39 = vadd.f32 %v2344_v42, %v839_v37  ;;  %v1147_v40 = vadd.f32 %v2344_v42, %v879_v38  ;;  %v762_v41 = vpop.f32.mrf.mxu0  ;;  %v802_v43 = vpop.f32.mrf.mxu1 }
 0x134   : > { %v1100_v50 = vadd.f32 %v2344_v42, %v762_v41  ;;  %v1116_v51 = vadd.f32 %v2344_v42, %v802_v43 }
 0x135   : > { %v1195_v46 = vmax.f32 %v1131_v39, 0.0  ;;  %v1211_v47 = vmax.f32 %v1147_v40, 0.0 }
 0x136   : > { %v1164_v58 = vmax.f32 %v1100_v50, 0.0  ;;  %v1180_v59 = vmax.f32 %v1116_v51, 0.0 }
 0x137   : > { %v1805_v48 = vpack.c.bf16 %v1195_v46, %v1194_v44  ;;  %v1845_v49 = vpack.c.bf16 %v1211_v47, %v1210_v45 }
 0x139   : > { %1873 = vst [vmem:[%s2354_s20 + $0xb0] sm:$0xff] %v1805_v48  }
 0x13a   : > { %1881 = vst [vmem:[%s2354_s20 + $0xf0] sm:$0xff] %v1845_v49   ;;  %v842_v52 = vpop.f32.mrf.mxu2  ;;  %v882_v53 = vpop.f32.mrf.mxu3 }
 0x13b   : > { %v764_v54 = vpop.f32.mrf.mxu0  ;;  %v804_v55 = vpop.f32.mrf.mxu1  ;;  %v1132_v0 = vadd.f32 %v2344_v42, %v842_v52  ;;  %v1148_v1 = vadd.f32 %v2344_v42, %v882_v53 }
 0x13c   : > { %v1101_v56 = vadd.f32 %v2344_v42, %v764_v54  ;;  %v1117_v57 = vadd.f32 %v2344_v42, %v804_v55 }
 0x13d   : > { %v1196_v6 = vmax.f32 %v1132_v0, 0.0  ;;  %v1212_v7 = vmax.f32 %v1148_v1, 0.0 }
 0x13e   : > { %v1165_v60 = vmax.f32 %v1101_v56, 0.0  ;;  %v1181_v61 = vmax.f32 %v1117_v57, 0.0 }
 0x140   : > { %v1730_v62 = vpack.c.bf16 %v1165_v60, %v1164_v58  ;;  %v1770_v63 = vpack.c.bf16 %v1181_v61, %v1180_v59 }
 0x142   : > { %1858 = vst [vmem:[%s2354_s20 + $0x38] sm:$0xff] %v1730_v62   ;;  %v844_v2 = vpop.f32.mrf.mxu2  ;;  %v884_v3 = vpop.f32.mrf.mxu3 }
 0x143   : > { %1866 = vst [vmem:[%s2354_s20 + $0x78] sm:$0xff] %v1770_v63   ;;  %v1133_v4 = vadd.f32 %v2344_v42, %v844_v2  ;;  %v1149_v5 = vadd.f32 %v2344_v42, %v884_v3 }
 0x145   : > { %v1197_v8 = vmax.f32 %v1133_v4, 0.0  ;;  %v1213_v9 = vmax.f32 %v1149_v5, 0.0 }
 0x147   : > { %v1810_v10 = vpack.c.bf16 %v1197_v8, %v1196_v6  ;;  %v1850_v11 = vpack.c.bf16 %v1213_v9, %v1212_v7 }
 0x149   : > { %1874 = vst [vmem:[%s2354_s20 + $0xb8] sm:$0xff] %v1810_v10  }
 0x14a   : > { %1882 = vst [vmem:[%s2354_s20 + $0xf8] sm:$0xff] %v1850_v11  }
 0x14b   : > { %2112 = shalt.err (!%p2109_p12)
}
 0x14c   : > { %s2177_s10 = smov 64   ;;  %s2178_s24 = smov 4  }
 0x14d   : > { %1917 = dma.vmem_to_hbm [thread:$0]  (%p2273_p0), %s1357_s15, 4096, %s1359_s23, %s1343_s27, %s2177_s10, %s2177_s10, %s2178_s24  }
 0x14e PF: > { %p1939_p13 = scmp.ge.s32.totalorder %s2171_s17, 2  ;;  %s1373_s18 = sand.u32 1, %s2151_s12  }
 0x14f   : > { %s1374_s20 = scalar_lea.sflag [#allocation5], %s1373_s18 }
 0x150   : > { %p1931_p2 = pnand %p1939_p13, %p2244_p5 }
 0x152   : > { %p1932_p4 = pneg %p1931_p2 }
 0x154   : > { %2146 = dma.done.wait (%p1932_p4), %s1374_s20, 4096  }
 0x155   : > { %2148 = vsyncadd (%p1932_p4), %s1374_s20, 4294963200  ;;  %s20_s17 = sadd.s32 1, %s2171_s17   ;;  %s2493_s12 = smov %s2155_s13 }
 0x156   : > { %p17_p6 = scmp.ge.s32.totalorder %s20_s17, 18   ;;  %s2494_s13 = smov %s2159_s14 }
 0x157   : > { %s2495_s14 = smov %s2283_s25  ;;  %s2496_s15 = smov %s2167_s16 }
 0x158   : > { %s2497_s16 = smov %s2499_s9  ;;  %19 = sbr.rel (!%p17_p6) target bundleno = 7 (0x7), region = 95 }
 0x15d   :  { %1380 = vsyncpa [#allocation4], 1 }
 0x15e   :  { %1382 = vsyncpa [#allocation4 + $0x1], 1 }
 0x15f   :  { %1383 = vsyncpa [#allocation7], 1 }
 0x160   :  { %1384 = vsyncpa [#allocation5], 1 }
 0x161   :  { %1386 = vsyncpa [#allocation5 + $0x1], 1 }

</bundles_post_ra>
